<compile_context>
chip_gen: v7x
topology: tpu7x:2x2x1
jax: 0.10.0
libtpu: 0.0.40
codegen_flags: <defaults>
</compile_context>

<pallas_src>
import functools

import jax
import jax.numpy as jnp
from jax.experimental import pallas as pl
from jax.experimental.pallas import tpu as pltpu


def _round_up(n, m):
    return ((n + m - 1) // m) * m


def _auto_num_batch_tiles(batch):
    """2 parallel batch tiles only where there are 2 TensorCores (v7x); else 1."""
    if batch < 256:
        return 1
    try:
        kind = jax.devices()[0].device_kind.lower()
    except Exception:  # pragma: no cover - defensive
        return 1
    return 2 if "v7" in kind else 1


def policy_net_kernel(x_ref, w1_ref, b1_ref, w2_ref, b2_ref, o_ref, *,
                      action_bound, state_dim, action_dim):
    """Shapes (batch on the lane axis):
       x: (S, BT), w1: (H, S), b1: (H, 1),
       w2: (H, 1) when A==1 else (A, H), b2: SMEM (A,), out: (A, BT).
    """
    x = x_ref[...]                                  # (S, BT)
    w1 = w1_ref[...]                                # (H, S)

    # fc1: K = state_dim (tiny) -> unrolled VPU broadcast-mul-adds, h lives as (H, BT)
    # so every vreg is lane-full (BT >= 128). No MXU, no K-padding relayout.
    h = w1[:, 0:1] * x[0:1, :]                      # (H, 1) * (1, BT) -> (H, BT)
    for k in range(1, state_dim):                   # static unroll
        h = h + w1[:, k:k + 1] * x[k:k + 1, :]
    h = jnp.maximum(h + b1_ref[...], 0.0)           # + (H, 1) bias, relu

    # fc2
    if action_dim == 1:
        # (H, BT) * (H, 1) -> sublane reduce over H: VPU multiply + XLU reduce.
        a = jnp.sum(h * w2_ref[...], axis=0, keepdims=True)   # (1, BT)
        a = a + b2_ref[0]                                      # scalar bias from SMEM
    else:
        # General case: (A, H) x (H, BT) -> (A, BT), contraction over H.
        a = jax.lax.dot_general(w2_ref[...], h, (((1,), (0,)), ((), ())),
                                preferred_element_type=jnp.float32)
        bias = jnp.stack([b2_ref[i] for i in range(action_dim)]).reshape(action_dim, 1)
        a = a + bias

    o_ref[...] = jnp.tanh(a) * action_bound         # (A, BT), lane-dense store


def policy_net_forward(x, w1, b1, w2, b2, action_bound, *, num_batch_tiles=None):
    """PolicyNet forward.

    x : (B, state_dim) float32
    w1: (hidden_dim, state_dim), b1: (hidden_dim,)     -- PyTorch Linear layout
    w2: (action_dim, hidden_dim), b2: (action_dim,)    -- PyTorch Linear layout
    Returns (B, action_dim) float32.
    """
    B, S = x.shape
    H = w1.shape[0]
    A = w2.shape[0]

    if num_batch_tiles is None:
        num_batch_tiles = _auto_num_batch_tiles(B)

    # Layout plumbing done once in the wrapper (XLA), not per kernel step.
    xt = x.T                                         # (S, B): batch on lanes
    b1_col = b1.reshape(H, 1)
    w2_op = w2.reshape(H, 1) if A == 1 else w2        # (1,H) -> (H,1) is a pure reshape
    b2_s = b2.reshape(A)                              # SMEM scalar(s)

    kernel = functools.partial(
        policy_net_kernel,
        action_bound=float(action_bound),             # static constant
        state_dim=S,
        action_dim=A,
    )

    if num_batch_tiles <= 1:
        # Single no-grid invocation: whole problem lives in VMEM (a few hundred KB),
        # one input DMA, one output DMA. Right choice on single-TC v5e/v6e.
        Bp = _round_up(max(B, 1), 128)                # lane-dense width
        xp = xt if Bp == B else jnp.pad(xt, ((0, 0), (0, Bp - B)))
        out = pl.pallas_call(
            kernel,
            out_shape=jax.ShapeDtypeStruct((A, Bp), jnp.float32),
            in_specs=[
                pl.BlockSpec(memory_space=pltpu.MemorySpace.VMEM),   # x (S, Bp)
                pl.BlockSpec(memory_space=pltpu.MemorySpace.VMEM),   # w1 (H, S)
                pl.BlockSpec(memory_space=pltpu.MemorySpace.VMEM),   # b1 (H, 1)
                pl.BlockSpec(memory_space=pltpu.MemorySpace.VMEM),   # w2
                pl.BlockSpec(memory_space=pltpu.MemorySpace.SMEM),   # b2 scalar(s)
            ],
            out_specs=pl.BlockSpec(memory_space=pltpu.MemorySpace.VMEM),
        )(xp, w1, b1_col, w2_op, b2_s)
    else:
        # v7x path: exactly num_batch_tiles (=2) parallel batch tiles, one per TensorCore.
        bt = _round_up(-(-B // num_batch_tiles), 128)
        Bp = bt * num_batch_tiles
        xp = xt if Bp == B else jnp.pad(xt, ((0, 0), (0, Bp - B)))
        out = pl.pallas_call(
            kernel,
            out_shape=jax.ShapeDtypeStruct((A, Bp), jnp.float32),
            grid=(num_batch_tiles,),
            in_specs=[
                pl.BlockSpec((S, bt), lambda i: (0, i)),             # x tile (dense DMA)
                pl.BlockSpec((H, S), lambda i: (0, 0)),              # w1 resident
                pl.BlockSpec((H, 1), lambda i: (0, 0)),              # b1 resident
                pl.BlockSpec(w2_op.shape, lambda i: (0, 0)),         # w2 resident
                pl.BlockSpec(memory_space=pltpu.MemorySpace.SMEM),   # b2 scalar(s)
            ],
            out_specs=pl.BlockSpec((A, bt), lambda i: (0, i)),
            compiler_params=pltpu.CompilerParams(
                dimension_semantics=("parallel",),
            ),
        )(xp, w1, b1_col, w2_op, b2_s)

    return out[:, :B].T                               # back to the module's (B, A) layout


def reference_forward(x, w1, b1, w2, b2, action_bound):
    h = jnp.maximum(x @ w1.T + b1, 0.0)
    return jnp.tanh(h @ w2.T + b2) * action_bound


if __name__ == "__main__":
    # Pendulum-v1: state_dim=3, action_dim=1, action_bound=2.0, hidden_dim=64.
    state_dim, hidden_dim, action_dim = 3, 64, 1
    action_bound = 2.0

    key = jax.random.PRNGKey(0)
    kx1, kx2, k1, kb1, k2, kb2 = jax.random.split(key, 6)

    # PyTorch-Linear-style init, stored in PyTorch's native (out, in) layout.
    lim1 = 1.0 / jnp.sqrt(state_dim)
    w1 = jax.random.uniform(k1, (hidden_dim, state_dim), jnp.float32, -lim1, lim1)
    b1 = jax.random.uniform(kb1, (hidden_dim,), jnp.float32, -lim1, lim1)
    lim2 = 1.0 / jnp.sqrt(hidden_dim)
    w2 = jax.random.uniform(k2, (action_dim, hidden_dim), jnp.float32, -lim2, lim2)
    b2 = jax.random.uniform(kb2, (action_dim,), jnp.float32, -lim2, lim2)

    # 1) Small rollout batch -> single no-grid invocation.
    x_small = jax.random.normal(kx1, (8, state_dim), dtype=jnp.float32)
    out_small = jax.block_until_ready(
        policy_net_forward(x_small, w1, b1, w2, b2, action_bound))
    ref_small = reference_forward(x_small, w1, b1, w2, b2, action_bound)
    assert out_small.shape == (8, action_dim)
    assert jnp.allclose(out_small, ref_small, atol=1e-5, rtol=1e-5), "mismatch (small path)"

    # 2) Replay batch, auto tiling (1 tile on single-TC chips, 2 on v7x).
    x_big = jax.random.normal(kx2, (512, state_dim), dtype=jnp.float32)
    out_auto = jax.block_until_ready(
        policy_net_forward(x_big, w1, b1, w2, b2, action_bound))
    ref_big = reference_forward(x_big, w1, b1, w2, b2, action_bound)
    assert out_auto.shape == (512, action_dim)
    assert jnp.allclose(out_auto, ref_big, atol=1e-5, rtol=1e-5), "mismatch (auto path)"

    # 3) Force the 2-tile parallel-grid path (the v7x configuration) to exercise it.
    out_2tile = jax.block_until_ready(
        policy_net_forward(x_big, w1, b1, w2, b2, action_bound, num_batch_tiles=2))
    assert out_2tile.shape == (512, action_dim)
    assert jnp.allclose(out_2tile, ref_big, atol=1e-5, rtol=1e-5), "mismatch (2-tile path)"

    print("KERNEL_OK")
</pallas_src>

<mosaic_0001>
module attributes {stable_mosaic.version = 11 : i64} {
  func.func @policy_net_kernel(%arg0: memref<3x128xf32, #tpu.memory_space<vmem>>, %arg1: memref<64x3xf32, #tpu.memory_space<vmem>>, %arg2: memref<64x1xf32, #tpu.memory_space<vmem>>, %arg3: memref<64x1xf32, #tpu.memory_space<vmem>>, %arg4: memref<1xf32, #tpu.memory_space<smem>>, %arg5: memref<1x128xf32, #tpu.memory_space<vmem>>) attributes {dimension_semantics = [], scalar_prefetch = 0 : i64, scratch_operands = 0 : i64, tpu.core_type = #tpu.core_type<tc>} {
    %c0 = arith.constant 0 : index
    %c0_0 = arith.constant 0 : index
    %0 = vector.load %arg0[%c0, %c0_0] : memref<3x128xf32, #tpu.memory_space<vmem>>, vector<3x128xf32>
    %c0_1 = arith.constant 0 : index
    %c0_2 = arith.constant 0 : index
    %1 = vector.load %arg1[%c0_1, %c0_2] : memref<64x3xf32, #tpu.memory_space<vmem>>, vector<64x3xf32>
    %2 = vector.extract_strided_slice %1 {offsets = [0, 0], sizes = [64, 1], strides = [1, 1]} : vector<64x3xf32> to vector<64x1xf32>
    %3 = vector.extract_strided_slice %0 {offsets = [0, 0], sizes = [1, 128], strides = [1, 1]} : vector<3x128xf32> to vector<1x128xf32>
    %4 = vector.broadcast %2 : vector<64x1xf32> to vector<64x128xf32>
    %5 = vector.broadcast %3 : vector<1x128xf32> to vector<64x128xf32>
    %6 = arith.mulf %4, %5 : vector<64x128xf32>
    %7 = vector.extract_strided_slice %1 {offsets = [0, 1], sizes = [64, 1], strides = [1, 1]} : vector<64x3xf32> to vector<64x1xf32>
    %8 = vector.extract_strided_slice %0 {offsets = [1, 0], sizes = [1, 128], strides = [1, 1]} : vector<3x128xf32> to vector<1x128xf32>
    %9 = vector.broadcast %7 : vector<64x1xf32> to vector<64x128xf32>
    %10 = vector.broadcast %8 : vector<1x128xf32> to vector<64x128xf32>
    %11 = arith.mulf %9, %10 : vector<64x128xf32>
    %12 = arith.addf %6, %11 : vector<64x128xf32>
    %13 = vector.extract_strided_slice %1 {offsets = [0, 2], sizes = [64, 1], strides = [1, 1]} : vector<64x3xf32> to vector<64x1xf32>
    %14 = vector.extract_strided_slice %0 {offsets = [2, 0], sizes = [1, 128], strides = [1, 1]} : vector<3x128xf32> to vector<1x128xf32>
    %15 = vector.broadcast %13 : vector<64x1xf32> to vector<64x128xf32>
    %16 = vector.broadcast %14 : vector<1x128xf32> to vector<64x128xf32>
    %17 = arith.mulf %15, %16 : vector<64x128xf32>
    %18 = arith.addf %12, %17 : vector<64x128xf32>
    %c0_3 = arith.constant 0 : index
    %c0_4 = arith.constant 0 : index
    %19 = vector.load %arg2[%c0_3, %c0_4] : memref<64x1xf32, #tpu.memory_space<vmem>>, vector<64x1xf32>
    %20 = vector.broadcast %19 : vector<64x1xf32> to vector<64x128xf32>
    %21 = arith.addf %18, %20 : vector<64x128xf32>
    %cst = arith.constant 0.000000e+00 : f32
    %22 = vector.broadcast %cst : f32 to vector<64x128xf32>
    %23 = arith.maximumf %21, %22 : vector<64x128xf32>
    %c0_5 = arith.constant 0 : index
    %c0_6 = arith.constant 0 : index
    %24 = vector.load %arg3[%c0_5, %c0_6] : memref<64x1xf32, #tpu.memory_space<vmem>>, vector<64x1xf32>
    %25 = vector.broadcast %24 : vector<64x1xf32> to vector<64x128xf32>
    %26 = arith.mulf %23, %25 : vector<64x128xf32>
    %cst_7 = arith.constant dense<0.000000e+00> : vector<128xf32>
    %27 = vector.multi_reduction <add>, %26, %cst_7 [0] : vector<64x128xf32> to vector<128xf32>
    %28 = vector.shape_cast %27 : vector<128xf32> to vector<1x128xf32>
    %c0_8 = arith.constant 0 : index
    %29 = memref.load %arg4[%c0_8] : memref<1xf32, #tpu.memory_space<smem>>
    %30 = vector.broadcast %29 : f32 to vector<1x128xf32>
    %31 = arith.addf %28, %30 : vector<1x128xf32>
    %32 = math.tanh %31 : vector<1x128xf32>
    %cst_9 = arith.constant 2.000000e+00 : f32
    %33 = vector.broadcast %cst_9 : f32 to vector<1x128xf32>
    %34 = arith.mulf %32, %33 : vector<1x128xf32>
    %c0_10 = arith.constant 0 : index
    %c0_11 = arith.constant 0 : index
    %35 = vector.load %arg5[%c0_10, %c0_11] : memref<1x128xf32, #tpu.memory_space<vmem>>, vector<1x128xf32>
    tpu.vector_store %arg5[%c0_10, %c0_11], %34 {strides = array<i32>} : memref<1x128xf32, #tpu.memory_space<vmem>>, vector<1x128xf32>,
    return
  }
}

</mosaic_0001>

<bundles_post_ra>
// kernel: tpu_custom_call.1
= control target key start
LH: loop header
LB: loop body
LE: loop exit
PB: predicated region body
PF: predicated region fallthrough
CT: control target
= control target key end

     0   :  { %v385_v2 = vmov 1   ;;  %v386_v3 = vmov 0   ;;  %v387_v5 = vmov 2   ;;  %s549_s0 = inlined_call_operand.vmem [shape: f32[3,128], index: 0, kind: input, shape index: {}]   ;;  %s550_s1 = inlined_call_operand.vmem [shape: f32[64,3], index: 1, kind: input, shape index: {}]   ;;  %s551_s2 = inlined_call_operand.vmem [shape: f32[64,1], index: 2, kind: input, shape index: {}]   ;;  %s552_s3 = inlined_call_operand.vmem [shape: f32[64,1], index: 3, kind: input, shape index: {}]   ;;  %s553_s4 = inlined_call_operand.<no memory space> [shape: f32[1], index: 4, kind: input, shape index: {}]   ;;  %s554_s5 = inlined_call_operand.hbm [shape: f32[1,128], index: 5, kind: output, shape index: {}]  }
   0x1   :  { %v25_v0 = vld [vmem:[%s550_s1 + $0x10] sm:$0xff]  ;;  %v23_v1 = vld [vmem:[%s550_s1] sm:$0xff]  ;;  %345 = vset.pattern.permute.xlu0 %v385_v2  ;;  %344 = vset.pattern.permute.xlu1 %v386_v3  ;;  %v26_v4 = vld [vmem:[%s550_s1 + $0x18] sm:$0xff] }
   0x2   :  { %43 = vperm.xlu1 %344, %v25_v0   ;;  %84 = vperm.xlu0 %345, %v23_v1   ;;  %v28_v6 = vld [vmem:[%s550_s1 + $0x28] sm:$0xff] }
   0x6   :  { %48 = vperm.xlu1 %344, %v26_v4   ;;  %347 = vset.pattern.permute.xlu0 %v387_v5 }
   0x7   :  { %136 = vperm.xlu0 %347, %v23_v1  }
   0x8   :  { %11 = vsyncpa [#allocation4], 0  ;;  %v30_v7 = vld [vmem:[%s550_s1 + $0x38] sm:$0xff]  ;;  %v24_v8 = vld [vmem:[%s550_s1 + $0x8] sm:$0xff]  ;;  %v71_v46 = vlaneseq  ;;  %s388_s15 = smov [#allocation3]  }
   0x9   :  { %v27_v9 = vld [vmem:[%s550_s1 + $0x20] sm:$0xff]  ;;  %v29_v10 = vld [vmem:[%s550_s1 + $0x30] sm:$0xff]  ;;  %v188_v12 = vld [vmem:[%s551_s2 + $0x8] sm:$0xff]  ;;  %s332_s16 = sshll.u32 %s388_s15, 4  ;;  %s333_s16 = int_to_ptr.vmem [resolvable:$true] %s332_s16 }
   0xa   :  { %58 = vperm.xlu1 %344, %v28_v6   ;;  %v187_v11 = vld [vmem:[%s551_s2] sm:$0xff]  ;;  %v189_v13 = vld [vmem:[%s551_s2 + $0x10] sm:$0xff]  ;;  %v252_v14 = vld [vmem:[%s552_s3 + $0x8] sm:$0xff]  ;;  %v72_v49 = vshrl.u32 %v71_v46, 7  ;;  %s361_s17 = scalar_lea.vmem %s333_s16, 16  ;;  %s365_s18 = scalar_lea.vmem %s333_s16, 32 }
   0xb   :  { %144 = vperm.xlu0 %347, %v25_v0   ;;  %v191_v15 = vld [vmem:[%s551_s2 + $0x20] sm:$0xff]  ;;  %v193_v16 = vld [vmem:[%s551_s2 + $0x30] sm:$0xff]  ;;  %v190_v17 = vld [vmem:[%s551_s2 + $0x18] sm:$0xff]  ;;  %p362_p0 = scmp.ne.s32.totalorder %s333_s16, %s361_s17  ;;  %p366_p1 = scmp.lt.s32.totalorder %s333_s16, %s333_s16 }
   0xc   :  { %v256_v18 = vld [vmem:[%s552_s3 + $0x28] sm:$0xff]  ;;  %v251_v19 = vld [vmem:[%s552_s3] sm:$0xff]  ;;  %v258_v20 = vld [vmem:[%s552_s3 + $0x38] sm:$0xff]  ;;  %v73_v52 = vsub.s32 0, %v72_v49  ;;  %v117_v53 = vsub.s32 1, %v72_v49  ;;  %v169_v58 = vsub.s32 2, %v72_v49  ;;  %p367_p2 = scmp.lt.s32.totalorder %s365_s18, %s361_s17 }
   0xd   :  { %v253_v21 = vld [vmem:[%s552_s3 + $0x10] sm:$0xff]  ;;  %v192_v22 = vld [vmem:[%s551_s2 + $0x28] sm:$0xff]  ;;  %v254_v23 = vld [vmem:[%s552_s3 + $0x18] sm:$0xff] }
   0xe   :  { %68 = vperm.xlu1 %344, %v30_v7   ;;  %v255_v24 = vld [vmem:[%s552_s3 + $0x20] sm:$0xff]  ;;  %v194_v25 = vld [vmem:[%s551_s2 + $0x38] sm:$0xff]  ;;  %v257_v26 = vld [vmem:[%s552_s3 + $0x30] sm:$0xff]  ;;  %p368_p3 = por %p367_p2, %p366_p1 }
   0xf   :  { %148 = vperm.xlu0 %347, %v26_v4   ;;  %v22_v54 = vld [vmem:[%s549_s0] sm:$0x7] }
  0x10   :  { %v511_v56 = vrot.slane %v22_v54, %v73_v52  ;;  %v118_v57 = vrot.slane %v22_v54, %v117_v53  ;;  %v514_v63 = vrot.slane %v22_v54, %v169_v58  ;;  %p369_p4 = pnand %p368_p3, %p362_p0 }
  0x12   :  { %346 = vset.pattern.permute.xlu1 %v385_v2 }
  0x13   :  { %88 = vperm.xlu1 %346, %v24_v8   ;;  %156 = vperm.xlu0 %347, %v28_v6  }
  0x17   :  { %92 = vperm.xlu1 %346, %v25_v0   ;;  %164 = vperm.xlu0 %347, %v30_v7  }
  0x1b   :  { %348 = vset.pattern.permute.xlu1 %v387_v5  ;;  %358 = vset.pattern.permute.xlu0 %v386_v3 }
  0x1c   :  { %140 = vperm.xlu1 %348, %v24_v8   ;;  %33 = vperm.xlu0 %358, %v23_v1  }
  0x20   :  { %349 = vset.pattern.permute.xlu1 %v385_v2  ;;  %38 = vperm.xlu0 %358, %v24_v8  }
  0x21   :  { %96 = vperm.xlu1 %349, %v26_v4  }
  0x24   :  { %53 = vperm.xlu0 %358, %v27_v9  }
  0x25   :  { %100 = vperm.xlu1 %349, %v27_v9  }
  0x28   :  { %63 = vperm.xlu0 %358, %v29_v10  }
  0x29   :  { %350 = vset.pattern.permute.xlu1 %v386_v3 }
  0x2a   :  { %197 = vperm.xlu1 %350, %v187_v11  }
  0x2c   :  { %202 = vperm.xlu0 %358, %v188_v12  }
  0x2e   :  { %351 = vset.pattern.permute.xlu1 %v385_v2 }
  0x2f   :  { %104 = vperm.xlu1 %351, %v28_v6  }
  0x30   :  { %207 = vperm.xlu0 %358, %v189_v13  }
  0x33   :  { %352 = vset.pattern.permute.xlu1 %v387_v5 }
  0x34   :  { %152 = vperm.xlu1 %352, %v27_v9   ;;  %266 = vperm.xlu0 %358, %v252_v14  }
  0x38   :  { %353 = vset.pattern.permute.xlu1 %v385_v2  ;;  %217 = vperm.xlu0 %358, %v191_v15  }
  0x39   :  { %108 = vperm.xlu1 %353, %v29_v10  }
  0x3c   :  { %227 = vperm.xlu0 %358, %v193_v16  }
  0x3d   :  { %354 = vset.pattern.permute.xlu1 %v386_v3 }
  0x3e   :  { %212 = vperm.xlu1 %354, %v190_v17  }
  0x40   :  { %286 = vperm.xlu0 %358, %v256_v18  }
  0x42   :  { %261 = vperm.xlu1 %354, %v251_v19  }
  0x44   :  { %296 = vperm.xlu0 %358, %v258_v20  }
  0x46   :  { %355 = vset.pattern.permute.xlu1 %v385_v2 }
  0x47   :  { %112 = vperm.xlu1 %355, %v30_v7  }
  0x4b   :  { %356 = vset.pattern.permute.xlu1 %v387_v5 }
  0x4c   :  { %160 = vperm.xlu1 %356, %v29_v10  }
  0x50   :  { %357 = vset.pattern.permute.xlu1 %v386_v3 }
  0x51   :  { %271 = vperm.xlu1 %357, %v253_v21  }
  0x55   :  { %222 = vperm.xlu1 %357, %v192_v22  }
  0x59   :  { %276 = vperm.xlu1 %357, %v254_v23  }
  0x5d   :  { %281 = vperm.xlu1 %357, %v255_v24  }
  0x61   :  { %232 = vperm.xlu1 %357, %v194_v25  }
  0x65   :  { %291 = vperm.xlu1 %357, %v257_v26  }
  0x81   :  { %v44_v27 = vpop.permute.xlu1 %43  ;;  %v85_v28 = vpop.permute.xlu0 %84 }
  0x82   :  { %v119_v60 = vmul.f32 %v118_v57, %v85_v28  ;;  %v77_v6 = vmul.f32 %v511_v56, %v44_v27 }
  0x85   :  { %v49_v29 = vpop.permute.xlu1 %48 }
  0x86   :  { %v137_v31 = vpop.permute.xlu0 %136  ;;  %v78_v13 = vmul.f32 %v511_v56, %v49_v29 }
  0x87   :  { %v171_v0 = vmul.f32 %v514_v63, %v137_v31 }
  0x89   :  { %v59_v30 = vpop.permute.xlu1 %58 }
  0x8a   :  { %v145_v33 = vpop.permute.xlu0 %144  ;;  %v80_v26 = vmul.f32 %v511_v56, %v59_v30 }
  0x8b   :  { %v173_v9 = vmul.f32 %v514_v63, %v145_v33 }
  0x8d   :  { %v502_v32 = vpop.permute.xlu1 %68 }
  0x8e   :  { %v149_v35 = vpop.permute.xlu0 %148 }
  0x8f   :  { %v174_v16 = vmul.f32 %v514_v63, %v149_v35 }
  0x92   :  { %v89_v34 = vpop.permute.xlu1 %88  ;;  %v504_v38 = vpop.permute.xlu0 %156 }
  0x93   :  { %v120_v7 = vmul.f32 %v118_v57, %v89_v34 }
  0x96   :  { %v93_v36 = vpop.permute.xlu1 %92  ;;  %v506_v40 = vpop.permute.xlu0 %164 }
  0x97   :  { %v121_v1 = vmul.f32 %v118_v57, %v93_v36 }
  0x99   :  { %v129_v10 = vadd.f32 %v121_v1, %v77_v6 }
  0x9b   :  { %v141_v37 = vpop.permute.xlu1 %140  ;;  %v34_v42 = vpop.permute.xlu0 %33  ;;  %v181_v24 = vadd.f32 %v173_v9, %v129_v10 }
  0x9c   :  { %v75_v61 = vmul.f32 %v511_v56, %v34_v42  ;;  %v172_v14 = vmul.f32 %v514_v63, %v141_v37 }
  0x9e   :  { %v127_v2 = vadd.f32 %v119_v60, %v75_v61 }
  0x9f   :  { %v39_v44 = vpop.permute.xlu0 %38 }
  0xa0   :  { %v97_v39 = vpop.permute.xlu1 %96  ;;  %v76_v3 = vmul.f32 %v511_v56, %v39_v44  ;;  %v179_v12 = vadd.f32 %v171_v0, %v127_v2 }
  0xa1   :  { %v122_v8 = vmul.f32 %v118_v57, %v97_v39 }
  0xa2   :  { %v128_v11 = vadd.f32 %v120_v7, %v76_v3 }
  0xa3   :  { %v54_v48 = vpop.permute.xlu0 %53  ;;  %v130_v17 = vadd.f32 %v122_v8, %v78_v13 }
  0xa4   :  { %v101_v41 = vpop.permute.xlu1 %100  ;;  %v79_v18 = vmul.f32 %v511_v56, %v54_v48  ;;  %v180_v22 = vadd.f32 %v172_v14, %v128_v11 }
  0xa5   :  { %v123_v19 = vmul.f32 %v118_v57, %v101_v41  ;;  %v182_v31 = vadd.f32 %v174_v16, %v130_v17  ;;  %v176_v41 = vmul.f32 %v514_v63, %v504_v38  ;;  %v82_v38 = vmul.f32 %v511_v56, %v502_v32 }
  0xa7   :  { %v64_v51 = vpop.permute.xlu0 %63  ;;  %v131_v29 = vadd.f32 %v123_v19, %v79_v18 }
  0xa9   :  { %v198_v43 = vpop.permute.xlu1 %197 }
  0xaa   :  { %v235_v21 = vadd.f32 %v198_v43, %v179_v12 }
  0xab   :  { %v203_v59 = vpop.permute.xlu0 %202 }
  0xac   :  { %v236_v27 = vadd.f32 %v203_v59, %v180_v22  ;;  %v243_v34 = vmax.f32 %v235_v21, 0.0 }
  0xae   :  { %v105_v45 = vpop.permute.xlu1 %104  ;;  %v244_v42 = vmax.f32 %v236_v27, 0.0 }
  0xaf   :  { %v208_v4 = vpop.permute.xlu0 %207  ;;  %v124_v23 = vmul.f32 %v118_v57, %v105_v45  ;;  %v81_v45 = vmul.f32 %v511_v56, %v64_v51 }
  0xb0   :  { %v237_v28 = vadd.f32 %v208_v4, %v181_v24  ;;  %v321_v24 = vstv %s553_s4 }
  0xb1   :  { %v132_v35 = vadd.f32 %v124_v23, %v80_v26 }
  0xb2   :  { %v245_v43 = vmax.f32 %v237_v28, 0.0 }
  0xb3   :  { %v153_v47 = vpop.permute.xlu1 %152  ;;  %v267_v20 = vpop.permute.xlu0 %266  ;;  %v184_v49 = vadd.f32 %v176_v41, %v132_v35 }
  0xb4   :  { %v175_v25 = vmul.f32 %v514_v63, %v153_v47  ;;  %v300_v30 = vmul.f32 %v267_v20, %v244_v42 }
  0xb6   :  { %v183_v37 = vadd.f32 %v175_v25, %v131_v29 }
  0xb7   :  { %v218_v36 = vpop.permute.xlu0 %217 }
  0xb8   :  { %v109_v50 = vpop.permute.xlu1 %108  ;;  %v239_v52 = vadd.f32 %v218_v36, %v183_v37 }
  0xb9   :  { %v125_v47 = vmul.f32 %v118_v57, %v109_v50 }
  0xba   :  { %v247_v1 = vmax.f32 %v239_v52, 0.0 }
  0xbb   :  { %v228_v60 = vpop.permute.xlu0 %227 }
  0xbd   :  { %v213_v55 = vpop.permute.xlu1 %212 }
  0xbe   :  { %v238_v39 = vadd.f32 %v213_v55, %v182_v31 }
  0xbf   :  { %v287_v7 = vpop.permute.xlu0 %286 }
  0xc0   :  { %v246_v53 = vmax.f32 %v238_v39, 0.0 }
  0xc1   :  { %v262_v62 = vpop.permute.xlu1 %261 }
  0xc2   :  { %v299_v44 = vmul.f32 %v262_v62, %v243_v34  ;;  %v133_v62 = vadd.f32 %v125_v47, %v81_v45 }
  0xc3   :  { %v297_v17 = vpop.permute.xlu0 %296 }
  0xc4   :  { %v307_v54 = vadd.f32 %v300_v30, %v299_v44 }
  0xc6   :  { %v113_v5 = vpop.permute.xlu1 %112 }
  0xc7   :  { %v126_v58 = vmul.f32 %v118_v57, %v113_v5  ;;  %v178_v57 = vmul.f32 %v514_v63, %v506_v40 }
  0xc9   :  { %v134_v2 = vadd.f32 %v126_v58, %v82_v38 }
  0xcb   :  { %v161_v15 = vpop.permute.xlu1 %160  ;;  %v186_v10 = vadd.f32 %v178_v57, %v134_v2 }
  0xcc   :  { %v177_v59 = vmul.f32 %v514_v63, %v161_v15 }
  0xce   :  { %v185_v50 = vadd.f32 %v177_v59, %v133_v62 }
  0xd0   :  { %v272_v33 = vpop.permute.xlu1 %271  ;;  %v241_v11 = vadd.f32 %v228_v60, %v185_v50 }
  0xd1   :  { %v301_v48 = vmul.f32 %v272_v33, %v245_v43 }
  0xd2   :  { %v249_v14 = vmax.f32 %v241_v11, 0.0 }
  0xd3   :  { %v308_v0 = vadd.f32 %v307_v54, %v301_v48 }
  0xd4   :  { %v223_v46 = vpop.permute.xlu1 %222 }
  0xd5   :  { %v240_v55 = vadd.f32 %v223_v46, %v184_v49 }
  0xd7   :  { %v248_v3 = vmax.f32 %v240_v55, 0.0 }
  0xd8   :  { %v277_v61 = vpop.permute.xlu1 %276 }
  0xd9   :  { %v302_v51 = vmul.f32 %v277_v61, %v246_v53  ;;  %v304_v8 = vmul.f32 %v287_v7, %v248_v3 }
  0xdb   :  { %v309_v4 = vadd.f32 %v308_v0, %v302_v51 }
  0xdc   :  { %v282_v6 = vpop.permute.xlu1 %281 }
  0xdd   :  { %v303_v5 = vmul.f32 %v282_v6, %v247_v1 }
  0xdf   :  { %v310_v9 = vadd.f32 %v309_v4, %v303_v5 }
  0xe0   :  { %v233_v12 = vpop.permute.xlu1 %232 }
  0xe1   :  { %v242_v32 = vadd.f32 %v233_v12, %v186_v10  ;;  %v311_v56 = vadd.f32 %v310_v9, %v304_v8 }
  0xe3   :  { %v250_v13 = vmax.f32 %v242_v32, 0.0 }
  0xe4   :  { %v292_v15 = vpop.permute.xlu1 %291 }
  0xe5   :  { %v305_v16 = vmul.f32 %v292_v15, %v249_v14  ;;  %v306_v18 = vmul.f32 %v297_v17, %v250_v13 }
  0xe7   :  { %v312_v19 = vadd.f32 %v311_v56, %v305_v16 }
  0xe9   :  { %v313_v20 = vadd.f32 %v312_v19, %v306_v18 }
  0xeb   :  { %v314_v21 = vrot.slane %v313_v20, 4 }
  0xed   :  { %v315_v22 = vadd.f32 %v314_v21, %v313_v20 }
  0xef   :  { %v316_v40 = vrot.slane %v315_v22, 2 }
  0xf1   :  { %v317_v63 = vadd.f32 %v316_v40, %v315_v22 }
  0xf3   :  { %v318_v23 = vrot.slane %v317_v63, 1 }
  0xf5   :  { %v319_v25 = vadd.f32 %v318_v23, %v317_v63 }
  0xf7   :  { %v322_v26 = vadd.f32 %v321_v24, %v319_v25 }
  0xf9   :  { %359 = vtanh.f32 %v322_v26 }
 0x103   :  { %v360_v27 = vpop.eup %359 }
 0x104   :  { %v324_v28 = vmul.f32 2.0, %v360_v27 }
 0x106   :  { %325 = vst [vmem:[#allocation3] sm:$0x1] %v324_v28 }
 0x107   :  { %372 = shalt.err (!%p369_p4)
}
 0x108   :  { %s373_s4 = scalar_lea.hbm %s554_s5, 16 }
 0x109   :  { %p374_p5 = scmp.ne.s32.totalorder %s554_s5, %s373_s4  ;;  %p377_p6 = scmp.lt.u32.totalorder %s373_s4, %s554_s5 }
 0x10b   :  { %p379_p7 = pnand %p377_p6, %p374_p5 }
 0x10d   :  { %382 = shalt.err (!%p379_p7)
}
 0x10e   :  { %335 = dma.vmem_to_hbm [thread:$0]  %s333_s16, 16, %s554_s5, [#allocation4]  }
 0x10f   :  { %383 = dma.done.wait [#allocation4], 16  }
 0x110   :  { %384 = vsyncadd [#allocation4], 4294967280 }
 0x111   :  { %339 = vsyncpa [#allocation4], 1 }

</bundles_post_ra>
